<compile_context>
chip_gen: v5e
topology: v5e:2x2
jax: 0.10.0
libtpu: 0.0.40
codegen_flags: <defaults>
</compile_context>

<pallas_src>
import functools

import jax
import jax.numpy as jnp
from jax import lax
from jax.experimental import pallas as pl
from jax.experimental.pallas import tpu as pltpu


def _round_up(x: int, m: int) -> int:
    return ((x + m - 1) // m) * m


# ---------------------------------------------------------------------------
# Kernels: multi-K-tile (accumulator in VMEM scratch, persists across k axis)
# ---------------------------------------------------------------------------
def _linear_kernel_bias(x_ref, w_ref, b_ref, o_ref, acc_ref):
    # x_ref : (tm, tk)  activations tile
    # w_ref : (tn, tk)  weight tile, PyTorch layout (out_features, in_features)
    # b_ref : (1, tn)   bias tile
    # o_ref : (tm, tn)  output tile
    # acc_ref: (tm, tn) f32 accumulator (VMEM scratch, persists across k)
    k = pl.program_id(2)

    @pl.when(k == 0)
    def _():
        # Fold the bias into the accumulator init (removes the epilogue add).
        acc_ref[...] = jnp.broadcast_to(
            b_ref[...].astype(jnp.float32), acc_ref.shape
        )

    # Contract x's K dim (axis 1) with w's K dim (axis 1): (tm,tk)x(tn,tk)->(tm,tn)
    acc_ref[...] += lax.dot_general(
        x_ref[...], w_ref[...],
        dimension_numbers=(((1,), (1,)), ((), ())),
        preferred_element_type=jnp.float32,
    )

    @pl.when(k == pl.num_programs(2) - 1)
    def _():
        o_ref[...] = acc_ref[...].astype(o_ref.dtype)


def _linear_kernel_nobias(x_ref, w_ref, o_ref, acc_ref):
    k = pl.program_id(2)

    @pl.when(k == 0)
    def _():
        acc_ref[...] = jnp.zeros_like(acc_ref)

    acc_ref[...] += lax.dot_general(
        x_ref[...], w_ref[...],
        dimension_numbers=(((1,), (1,)), ((), ())),
        preferred_element_type=jnp.float32,
    )

    @pl.when(k == pl.num_programs(2) - 1)
    def _():
        o_ref[...] = acc_ref[...].astype(o_ref.dtype)


# ---------------------------------------------------------------------------
# Kernels: single-K-tile fast path (no accumulator scratch, direct write)
# ---------------------------------------------------------------------------
def _linear_kernel_bias_1k(x_ref, w_ref, b_ref, o_ref):
    acc = lax.dot_general(
        x_ref[...], w_ref[...],
        dimension_numbers=(((1,), (1,)), ((), ())),
        preferred_element_type=jnp.float32,
    )
    o_ref[...] = (acc + b_ref[...].astype(jnp.float32)).astype(o_ref.dtype)


def _linear_kernel_nobias_1k(x_ref, w_ref, o_ref):
    acc = lax.dot_general(
        x_ref[...], w_ref[...],
        dimension_numbers=(((1,), (1,)), ((), ())),
        preferred_element_type=jnp.float32,
    )
    o_ref[...] = acc.astype(o_ref.dtype)


def _choose_tiles(M: int, K: int, N: int):
    # MXU / lane friendly tiles, clamped to the (padded) problem size.
    # tm: sublane axis of x & out -> multiple of 8 ; tn, tk: lane axes -> mult of 128.
    tm = min(256, _round_up(M, 8))
    tk = min(512, _round_up(K, 128))
    tn = min(256, _round_up(N, 128))
    return tm, tk, tn


@functools.partial(jax.jit, static_argnames=("has_bias",))
def _linear_forward_2d(x2d, weight, bias, has_bias):
    M, K = x2d.shape
    N = weight.shape[0]

    tm, tk, tn = _choose_tiles(M, K, N)
    M_pad = _round_up(M, tm)
    K_pad = _round_up(K, tk)
    N_pad = _round_up(N, tn)

    # Zero-padding is correctness-neutral: padded K columns contribute 0 to the
    # dot product; padded M rows / N columns are sliced off afterwards.
    x_p = x2d
    if (M_pad, K_pad) != (M, K):
        x_p = jnp.pad(x2d, ((0, M_pad - M), (0, K_pad - K)))
    w_p = weight
    if (N_pad, K_pad) != (N, K):
        w_p = jnp.pad(weight, ((0, N_pad - N), (0, K_pad - K)))

    kt = K_pad // tk
    single_k = kt == 1

    out_shape = jax.ShapeDtypeStruct((M_pad, N_pad), x2d.dtype)
    vmem_limit = pltpu.CompilerParams(
        dimension_semantics=("parallel", "parallel") if single_k
        else ("parallel", "parallel", "arbitrary"),
        vmem_limit_bytes=48 * 1024 * 1024,  # safe on v5e/v6e/v7x for these tiles
    )

    if single_k:
        grid = (M_pad // tm, N_pad // tn)
        x_spec = pl.BlockSpec((tm, tk), lambda i, j: (i, 0))
        w_spec = pl.BlockSpec((tn, tk), lambda i, j: (j, 0))
        o_spec = pl.BlockSpec((tm, tn), lambda i, j: (i, j))
        b_spec = pl.BlockSpec((1, tn), lambda i, j: (0, j))
        scratch = []
        kernel_b, kernel_nb = _linear_kernel_bias_1k, _linear_kernel_nobias_1k
    else:
        grid = (M_pad // tm, N_pad // tn, kt)
        x_spec = pl.BlockSpec((tm, tk), lambda i, j, k: (i, k))
        w_spec = pl.BlockSpec((tn, tk), lambda i, j, k: (j, k))
        o_spec = pl.BlockSpec((tm, tn), lambda i, j, k: (i, j))
        b_spec = pl.BlockSpec((1, tn), lambda i, j, k: (0, j))
        scratch = [pltpu.VMEM((tm, tn), jnp.float32)]
        kernel_b, kernel_nb = _linear_kernel_bias, _linear_kernel_nobias

    if has_bias:
        b_p = bias.reshape(1, N)
        if N_pad != N:
            b_p = jnp.pad(b_p, ((0, 0), (0, N_pad - N)))
        out = pl.pallas_call(
            kernel_b,
            out_shape=out_shape,
            grid_spec=pltpu.PrefetchScalarGridSpec(
                num_scalar_prefetch=0,
                grid=grid,
                in_specs=[x_spec, w_spec, b_spec],
                out_specs=o_spec,
                scratch_shapes=scratch,
            ),
            compiler_params=vmem_limit,
        )(x_p, w_p, b_p)
    else:
        out = pl.pallas_call(
            kernel_nb,
            out_shape=out_shape,
            grid_spec=pltpu.PrefetchScalarGridSpec(
                num_scalar_prefetch=0,
                grid=grid,
                in_specs=[x_spec, w_spec],
                out_specs=o_spec,
                scratch_shapes=scratch,
            ),
            compiler_params=vmem_limit,
        )(x_p, w_p)

    return out[:M, :N]


def linear_forward(x, weight, bias=None):
    """Forward pass of Linear: x (*, in_features) -> (*, out_features).

    weight: (out_features, in_features)  (PyTorch layout, NOT pre-transposed)
    bias:   (out_features,) or None
    """
    out_features, in_features = weight.shape
    leading = x.shape[:-1]
    x2d = x.reshape(-1, in_features)

    out2d = _linear_forward_2d(x2d, weight, bias, bias is not None)
    return out2d.reshape(*leading, out_features)


if __name__ == "__main__":
    key = jax.random.PRNGKey(0)
    k_x, k_w, k_b = jax.random.split(key, 3)

    batch, seq = 2, 8
    in_features, out_features = 32, 64

    # Deterministic parameter init matching the module's scheme:
    #   sf * (2 * U[0,1) - 1)  with sf = in_features ** -0.5
    sf = in_features ** (-0.5)
    weight = sf * (2.0 * jax.random.uniform(k_w, (out_features, in_features), jnp.float32) - 1.0)
    bias = sf * (2.0 * jax.random.uniform(k_b, (out_features,), jnp.float32) - 1.0)

    x = jax.random.normal(k_x, (batch, seq, in_features), jnp.float32)

    # With bias
    out = linear_forward(x, weight, bias)
    out = jax.block_until_ready(out)
    ref = x @ weight.T + bias
    assert out.shape == (batch, seq, out_features)
    assert jnp.allclose(out, ref, atol=1e-5, rtol=1e-5)

    # Without bias (bias=False path of the module)
    out_nb = linear_forward(x, weight, None)
    out_nb = jax.block_until_ready(out_nb)
    ref_nb = x @ weight.T
    assert jnp.allclose(out_nb, ref_nb, atol=1e-5, rtol=1e-5)

    # Larger, multi-tile case to exercise the (i, j, k) accumulator path.
    k_x2, k_w2, k_b2 = jax.random.split(jax.random.PRNGKey(1), 3)
    M2, K2, N2 = 384, 640, 320
    x2 = jax.random.normal(k_x2, (M2, K2), jnp.float32)
    w2 = jax.random.normal(k_w2, (N2, K2), jnp.float32) * (K2 ** -0.5)
    b2 = jax.random.normal(k_b2, (N2,), jnp.float32)
    out2 = jax.block_until_ready(linear_forward(x2, w2, b2))
    ref2 = x2 @ w2.T + b2
    assert jnp.allclose(out2, ref2, atol=1e-4, rtol=1e-4)

    print("KERNEL_OK")
</pallas_src>

<mosaic_0001>
module attributes {stable_mosaic.version = 11 : i64} {
  func.func @_linear_kernel_bias_1k(%arg0: i32, %arg1: i32, %arg2: memref<16x128xf32, #tpu.memory_space<vmem>>, %arg3: memref<128x128xf32, #tpu.memory_space<vmem>>, %arg4: memref<1x128xf32, #tpu.memory_space<vmem>>, %arg5: memref<16x128xf32, #tpu.memory_space<vmem>>) attributes {dimension_semantics = [#tpu.dimension_semantics<parallel>, #tpu.dimension_semantics<parallel>], iteration_bounds = array<i64: 1, 1>, scalar_prefetch = 0 : i64, scratch_operands = 0 : i64, tpu.core_type = #tpu.core_type<tc>, window_params = [{transform_indices = @transform_0, window_bounds = array<i64: 16, 128>}, {transform_indices = @transform_1, window_bounds = array<i64: 128, 128>}, {transform_indices = @transform_2, window_bounds = array<i64: 1, 128>}, {transform_indices = @transform_3, window_bounds = array<i64: 16, 128>}]} {
    %c0 = arith.constant 0 : index
    %c0_0 = arith.constant 0 : index
    %0 = vector.load %arg2[%c0, %c0_0] : memref<16x128xf32, #tpu.memory_space<vmem>>, vector<16x128xf32>
    %c0_1 = arith.constant 0 : index
    %c0_2 = arith.constant 0 : index
    %1 = vector.load %arg3[%c0_1, %c0_2] : memref<128x128xf32, #tpu.memory_space<vmem>>, vector<128x128xf32>
    %cst = arith.constant dense<0.000000e+00> : vector<16x128xf32>
    %2 = tpu.matmul %0, %1, %cst {dimension_numbers = #tpu.dot_dimension_numbers<[1], [1], [0], [0], [0, 0, 1, 0], [], []>} : vector<16x128xf32>, vector<128x128xf32>, vector<16x128xf32> -> vector<16x128xf32>
    %c0_3 = arith.constant 0 : index
    %c0_4 = arith.constant 0 : index
    %3 = vector.load %arg4[%c0_3, %c0_4] : memref<1x128xf32, #tpu.memory_space<vmem>>, vector<1x128xf32>
    %4 = vector.broadcast %3 : vector<1x128xf32> to vector<16x128xf32>
    %5 = arith.addf %2, %4 : vector<16x128xf32>
    %c0_5 = arith.constant 0 : index
    %c0_6 = arith.constant 0 : index
    %6 = vector.load %arg5[%c0_5, %c0_6] : memref<16x128xf32, #tpu.memory_space<vmem>>, vector<16x128xf32>
    tpu.vector_store %arg5[%c0_5, %c0_6], %5 {strides = array<i32>} : memref<16x128xf32, #tpu.memory_space<vmem>>, vector<16x128xf32>,
    return
  }
  func.func @transform_0(%arg0: i32, %arg1: i32) -> (i32, i32) {
    %c0_i32 = arith.constant 0 : i32
    %c0_i32_0 = arith.constant 0 : i32
    return %arg0, %c0_i32 : i32, i32
  }
  func.func @transform_1(%arg0: i32, %arg1: i32) -> (i32, i32) {
    %c0_i32 = arith.constant 0 : i32
    %c0_i32_0 = arith.constant 0 : i32
    return %arg1, %c0_i32 : i32, i32
  }
  func.func @transform_2(%arg0: i32, %arg1: i32) -> (i32, i32) {
    %c0_i32 = arith.constant 0 : i32
    %c0_i32_0 = arith.constant 0 : i32
    return %c0_i32, %arg1 : i32, i32
  }
  func.func @transform_3(%arg0: i32, %arg1: i32) -> (i32, i32) {
    %c0_i32 = arith.constant 0 : i32
    return %arg0, %arg1 : i32, i32
  }
}

</mosaic_0001>

<bundles_post_ra>
// kernel: _linear_forward_2d.1
= control target key start
LH: loop header
LB: loop body
LE: loop exit
PB: predicated region body
PF: predicated region fallthrough
CT: control target
= control target key end

     0   :  { %s209_s0 = inlined_call_operand.vmem [shape: f32[16,128], index: 0, kind: input, shape index: {}]   ;;  %s210_s1 = inlined_call_operand.vmem [shape: f32[128,128], index: 1, kind: input, shape index: {}]   ;;  %s211_s2 = inlined_call_operand.vmem [shape: f32[1,128], index: 2, kind: input, shape index: {}]   ;;  %s212_s3 = inlined_call_operand.hbm [shape: f32[16,128], index: 3, kind: output, shape index: {}]  }
   0x1   :  { %v32_v0 = vld [vmem:[%s210_s1 + $0x78] sm:$0xff]  ;;  %v31_v1 = vld [vmem:[%s210_s1 + $0x70] sm:$0xff] }
   0x2   :  { %37 = vmatpush.xpose.msra.mxu0 %v32_v0  ;;  %80 = vmatpush.xpose.msra.mxu1 %v32_v0 }
   0x3   :  { %8 = vsyncpa [#allocation3], 0  ;;  %v30_v2 = vld [vmem:[%s210_s1 + $0x68] sm:$0xff]  ;;  %v29_v3 = vld [vmem:[%s210_s1 + $0x60] sm:$0xff]  ;;  %s126_s23 = smov [#allocation2]   ;;  %s68_s26 = sshll.u32 %s212_s3, 4  ;;  %s69_s26 = int_to_ptr.hbm [resolvable:$true] %s68_s26 }
   0x4   :  { %v28_v4 = vld [vmem:[%s210_s1 + $0x58] sm:$0xff]  ;;  %v27_v5 = vld [vmem:[%s210_s1 + $0x50] sm:$0xff]  ;;  %v26_v6 = vld [vmem:[%s210_s1 + $0x48] sm:$0xff]  ;;  %s66_s24 = sshll.u32 %s126_s23, 4  ;;  %s128_s27 = smov 8   ;;  %s67_s24 = int_to_ptr.vmem [resolvable:$true] %s66_s24 }
   0x5   :  { %v25_v7 = vld [vmem:[%s210_s1 + $0x40] sm:$0xff]  ;;  %v24_v8 = vld [vmem:[%s210_s1 + $0x38] sm:$0xff]  ;;  %v23_v9 = vld [vmem:[%s210_s1 + $0x30] sm:$0xff] }
   0x6   :  { %38 = vmatpush.xpose.msra.mxu0 %v31_v1  ;;  %81 = vmatpush.xpose.msra.mxu1 %v31_v1  ;;  %v22_v10 = vld [vmem:[%s210_s1 + $0x28] sm:$0xff]  ;;  %v21_v11 = vld [vmem:[%s210_s1 + $0x20] sm:$0xff]  ;;  %v20_v12 = vld [vmem:[%s210_s1 + $0x18] sm:$0xff] }
   0x7   :  { %v19_v13 = vld [vmem:[%s210_s1 + $0x10] sm:$0xff]  ;;  %v18_v14 = vld [vmem:[%s210_s1 + $0x8] sm:$0xff]  ;;  %v17_v15 = vld [vmem:[%s210_s1] sm:$0xff] }
   0x8   :  { %v15_v16 = vld [vmem:[%s209_s0] sm:$0xff]  ;;  %v16_v17 = vld [vmem:[%s209_s0 + $0x8] sm:$0xff]  ;;  %s127_s0 = smov 128  }
   0x9   :  { %v99_v18 = vld [vmem:[%s211_s2] ss:$0 sm:$0xff] }
   0xa   :  { %39 = vmatpush.xpose.msra.mxu0 %v30_v2  ;;  %82 = vmatpush.xpose.msra.mxu1 %v30_v2 }
   0xe   :  { %40 = vmatpush.xpose.msra.mxu0 %v29_v3  ;;  %83 = vmatpush.xpose.msra.mxu1 %v29_v3 }
  0x12   :  { %41 = vmatpush.xpose.msra.mxu0 %v28_v4  ;;  %84 = vmatpush.xpose.msra.mxu1 %v28_v4 }
  0x16   :  { %42 = vmatpush.xpose.msra.mxu0 %v27_v5  ;;  %85 = vmatpush.xpose.msra.mxu1 %v27_v5 }
  0x1a   :  { %43 = vmatpush.xpose.msra.mxu0 %v26_v6  ;;  %86 = vmatpush.xpose.msra.mxu1 %v26_v6 }
  0x1e   :  { %44 = vmatpush.xpose.msra.mxu0 %v25_v7  ;;  %87 = vmatpush.xpose.msra.mxu1 %v25_v7 }
  0x22   :  { %45 = vmatpush.xpose.msra.mxu0 %v24_v8  ;;  %88 = vmatpush.xpose.msra.mxu1 %v24_v8 }
  0x26   :  { %46 = vmatpush.xpose.msra.mxu0 %v23_v9  ;;  %89 = vmatpush.xpose.msra.mxu1 %v23_v9 }
  0x2a   :  { %47 = vmatpush.xpose.msra.mxu0 %v22_v10  ;;  %90 = vmatpush.xpose.msra.mxu1 %v22_v10 }
  0x2e   :  { %48 = vmatpush.xpose.msra.mxu0 %v21_v11  ;;  %91 = vmatpush.xpose.msra.mxu1 %v21_v11 }
  0x32   :  { %49 = vmatpush.xpose.msra.mxu0 %v20_v12  ;;  %92 = vmatpush.xpose.msra.mxu1 %v20_v12 }
  0x36   :  { %50 = vmatpush.xpose.msra.mxu0 %v19_v13  ;;  %93 = vmatpush.xpose.msra.mxu1 %v19_v13 }
  0x3a   :  { %51 = vmatpush.xpose.msra.mxu0 %v18_v14  ;;  %94 = vmatpush.xpose.msra.mxu1 %v18_v14 }
  0x3e   :  { %52 = vmatpush.xpose.msra.mxu0 %v17_v15  ;;  %95 = vmatpush.xpose.msra.mxu1 %v17_v15 }
  0x41   :  { %53 = vmatmul.f32.vlgmr.msra.gmra.mxu0 %v15_v16  ;;  %56 = vmatmul.f32.vlgmr.msra.gmra.mxu1 %v16_v17 }
  0xbe   :  { %v54_v19 = vpop.f32.mrf.mxu0  ;;  %v57_v20 = vpop.f32.mrf.mxu1 }
  0xbf   :  { %v55_v21 = vadd.f32 %v99_v18, %v54_v19  ;;  %v58_v22 = vadd.f32 %v99_v18, %v57_v20 }
  0xc1   :  { %60 = vst [vmem:[#allocation2] sm:$0xff] %v55_v21 }
  0xc2   :  { %61 = vst [vmem:[#allocation2 + $0x8] sm:$0xff] %v58_v22 }
  0xc3   :  { %74 = dma.vmem_to_hbm [thread:$0]  %s67_s24, 256, %s69_s26, [#allocation3], %s127_s0, %s127_s0, %s128_s27  }
  0xc4   :  { %124 = dma.done.wait [#allocation3], 256  }
  0xc5   :  { %125 = vsyncadd [#allocation3], 4294967040 }
  0xc6   :  { %79 = vsyncpa [#allocation3], 1 }

</bundles_post_ra>
